<compile_context>
chip_gen: v6e
topology: v6e:2x2x1
jax: 0.10.0
libtpu: 0.0.40
codegen_flags: <defaults>
</compile_context>

<pallas_src>
import functools

import jax
import jax.numpy as jnp
from jax.experimental import pallas as pl
from jax.experimental.pallas import tpu as pltpu

# Module config (mirrors Adapter.__init__ defaults used for this port)
INPUT_SIZE = 32            # args.input_size
DOWN_SAMPLE = None         # args.down_sample -> input_size // 2
ADD_LN_BEFORE = True       # args.add_layer_norm_before
ADD_LN_AFTER = False       # args.add_layer_norm_after
RESIDUAL_BEFORE_LN = True  # args.residual_before_ln
NON_LINEARITY = "relu"     # args.non_linearity
LN_EPS = 1e-5              # nn.LayerNorm default

_SUBLANE = 16  # row granularity (covers f32 (8,128) and bf16 (16,128) tiling)


def _round_up(n, m):
    return ((n + m - 1) // m) * m


def _choose_pack(h, d):
    """Tokens packed per 128-lane group.  Prefer making BOTH pack*H and pack*D
    multiples of 128 so every load/store (x, residual, out, down, up) is lane
    dense (unmasked vst)."""
    for pack in range(1, 129):
        if (pack * h) % 128 == 0 and (pack * d) % 128 == 0:
            return pack
    if h <= 128 and 128 % h == 0:   # at least keep the H-sized tensors dense
        return 128 // h
    # TODO(synk): H>128 / awkward H falls back to lane-sparse tiles (slow path).
    return 1


def _adapter_kernel(x_ref, res_ref, seg_ref, wd_ref, bd_ref, wu_ref, bu_ref,
                    out_ref, down_ref, up_ref=None, *,
                    add_ln_before, store_up):
    """One (tm, Hp) row tile of packed tokens.

    x_ref / res_ref / out_ref / up_ref : (tm, Hp), Hp = pack*H   (lane dense)
    down_ref                           : (tm, Dp), Dp = pack*D   (lane dense)
    seg_ref : (Hp, Hp)  block-diagonal averaging matrix kron(I_pack, 1/H)
    wd_ref  : (Hp, Dp)  kron(I_pack, diag(ln_w) @ W_down)  (LN affine folded)
    wu_ref  : (Dp, Hp)  kron(I_pack, W_up)
    Block-diagonal weights keep the packed tokens independent.
    """
    x = x_ref[...].astype(jnp.float32)

    # adapter_norm_before: per-token LayerNorm == per-32-lane-segment stats,
    # computed with a tiny block-diagonal averaging matmul (MXU, no cross-lane ops).
    if add_ln_before:
        seg = seg_ref[...]
        mean = jnp.dot(x, seg, preferred_element_type=jnp.float32)
        xc = x - mean
        var = jnp.dot(xc * xc, seg, preferred_element_type=jnp.float32)
        x = xc * jax.lax.rsqrt(var + LN_EPS)        # affine folded into wd/bd

    # adapter_down: Linear(H -> D) + ReLU (block-diagonal, LN affine pre-folded)
    down = jnp.dot(x, wd_ref[...], preferred_element_type=jnp.float32) + bd_ref[...]
    down = jnp.maximum(down, 0.0)

    # adapter_up: Linear(D -> H)
    up = jnp.dot(down, wu_ref[...], preferred_element_type=jnp.float32) + bu_ref[...]

    res = res_ref[...].astype(jnp.float32)
    out = up
    if RESIDUAL_BEFORE_LN:
        out = out + res
    # TODO(synk): add_layer_norm_after (off in this config) would be a second
    # segmented LayerNorm on `out` right here.
    if not RESIDUAL_BEFORE_LN:
        out = out + res

    out_ref[...] = out.astype(out_ref.dtype)
    down_ref[...] = down.astype(down_ref.dtype)
    if store_up:
        up_ref[...] = up.astype(up_ref.dtype)


@functools.partial(jax.jit, static_argnames=("block_rows", "store_up"))
def adapter_forward(x, residual, ln_w, ln_b, wd, bd, wu, bu, *,
                    block_rows=2048, store_up=True):
    """x, residual: (T, H).  wd: (H, D), wu: (D, H)  (i.e. torch nn.Linear weight.T).
    Returns (output, down, up) like Adapter.forward.  With store_up=False the
    redundant `up` HBM write is skipped (up == output - residual) and None is
    returned in its place."""
    T, H = x.shape
    D = wd.shape[1]

    pack = _choose_pack(H, D)
    Hp, Dp = pack * H, pack * D

    # ---- one-time packed parameter prep (tiny, constant per call) ------------
    ln_w_v = ln_w.reshape(-1).astype(jnp.float32)           # (H,)
    ln_b_v = ln_b.reshape(-1).astype(jnp.float32)           # (H,)
    wd_f = wd.astype(jnp.float32)                            # (H, D)
    bd_f = bd.reshape(1, -1).astype(jnp.float32)             # (1, D)
    wu_f = wu.astype(jnp.float32)                            # (D, H)
    bu_f = bu.reshape(1, -1).astype(jnp.float32)             # (1, H)
    if ADD_LN_BEFORE:
        # exact fold: (xn*ln_w + ln_b) @ Wd + bd == xn @ (diag(ln_w)@Wd) + (ln_b@Wd + bd)
        bd_f = bd_f + ln_b_v[None, :] @ wd.astype(jnp.float32)
        wd_f = wd_f * ln_w_v[:, None]
    eye = jnp.eye(pack, dtype=jnp.float32)
    wd_blk = jnp.kron(eye, wd_f)                              # (Hp, Dp)
    wu_blk = jnp.kron(eye, wu_f)                              # (Dp, Hp)
    bd_p = jnp.tile(bd_f, (1, pack))                          # (1, Dp)
    bu_p = jnp.tile(bu_f, (1, pack))                          # (1, Hp)
    seg = jnp.kron(eye, jnp.full((H, H), 1.0 / H, jnp.float32))   # (Hp, Hp)

    # ---- pack tokens into lane-dense rows WITHOUT copying the big inputs -----
    rem = (-T) % pack                     # pad only to a pack multiple if needed
    if rem:
        x = jnp.pad(x, ((0, rem), (0, 0)))
        residual = jnp.pad(residual, ((0, rem), (0, 0)))
    Tp = (T + rem) // pack
    xp = x.reshape(Tp, Hp)                # row-major: free reshape, no copy
    rp = residual.reshape(Tp, Hp)
    if Tp < _SUBLANE:                     # tiny inputs: pad rows to one sublane tile
        xp = jnp.pad(xp, ((0, _SUBLANE - Tp), (0, 0)))
        rp = jnp.pad(rp, ((0, _SUBLANE - Tp), (0, 0)))
        Tp = _SUBLANE

    # ---- row tile: large (mem-bound), but keep >= 2 grid steps for v7x's 2 TCs
    tm = min(block_rows, _round_up(pl.cdiv(Tp, 2), _SUBLANE))
    n_blocks = pl.cdiv(Tp, tm)            # ragged last block: masked by Pallas

    row_h = pl.BlockSpec((tm, Hp), lambda i: (i, 0))
    row_d = pl.BlockSpec((tm, Dp), lambda i: (i, 0))
    const = lambda shape: pl.BlockSpec(shape, lambda i: (0,) * len(shape))

    out_specs = [row_h, row_d]
    out_shape = [jax.ShapeDtypeStruct((Tp, Hp), x.dtype),     # output (packed)
                 jax.ShapeDtypeStruct((Tp, Dp), x.dtype)]     # down   (packed)
    if store_up:
        out_specs.append(row_h)
        out_shape.append(jax.ShapeDtypeStruct((Tp, Hp), x.dtype))   # up (packed)

    kernel = functools.partial(_adapter_kernel,
                               add_ln_before=ADD_LN_BEFORE,
                               store_up=store_up)

    outs = pl.pallas_call(
        kernel,
        grid=(n_blocks,),
        in_specs=[
            row_h,                 # x (packed)
            row_h,                 # residual (packed)
            const((Hp, Hp)),       # segmented-mean matrix
            const((Hp, Dp)),       # W_down block-diagonal (LN affine folded)
            const((1, Dp)),        # b_down (tiled)
            const((Dp, Hp)),       # W_up block-diagonal
            const((1, Hp)),        # b_up (tiled)
        ],
        out_specs=out_specs,
        out_shape=out_shape,
        compiler_params=pltpu.CompilerParams(
            dimension_semantics=("parallel",),
            vmem_limit_bytes=48 * 1024 * 1024),
    )(xp, rp, seg, wd_blk, bd_p, wu_blk, bu_p)

    # packed (Tp, pack*C) is row-major identical to (Tp*pack, C): free reshape
    out = outs[0].reshape(Tp * pack, H)[:T]
    down = outs[1].reshape(Tp * pack, D)[:T]
    up = outs[2].reshape(Tp * pack, H)[:T] if store_up else None
    return out, down, up


def reference_forward(x, residual, ln_w, ln_b, wd, bd, wu, bu):
    xf = x.astype(jnp.float32)
    mean = jnp.mean(xf, axis=-1, keepdims=True)
    var = jnp.mean((xf - mean) ** 2, axis=-1, keepdims=True)
    xn = (xf - mean) / jnp.sqrt(var + LN_EPS) * ln_w.reshape(-1) + ln_b.reshape(-1)
    down = jnp.maximum(xn @ wd + bd.reshape(-1), 0.0)
    up = down @ wu + bu.reshape(-1)
    out = up + residual.astype(jnp.float32)
    return out, down, up


if __name__ == "__main__":
    H = INPUT_SIZE
    D = DOWN_SAMPLE if DOWN_SAMPLE is not None else INPUT_SIZE // 2

    key = jax.random.PRNGKey(0)
    kx, kr, kwd, kwu, kx2, kr2 = jax.random.split(key, 6)

    # parameters (init_bert_weights: Linear W ~ N(0, 0.02), bias 0; LN w=1, b=0)
    # NOTE: wd/wu are (in, out), i.e. the transpose of torch nn.Linear .weight.
    ln_w = jnp.ones((H,), jnp.float32)
    ln_b = jnp.zeros((H,), jnp.float32)
    wd = 0.02 * jax.random.normal(kwd, (H, D), dtype=jnp.float32)
    bd = jnp.zeros((D,), jnp.float32)
    wu = 0.02 * jax.random.normal(kwu, (D, H), dtype=jnp.float32)
    bu = jnp.zeros((H,), jnp.float32)

    # --- small (B, S, H) case matching the module defaults --------------------
    B, S = 2, 8
    x = jax.random.normal(kx, (B * S, H), jnp.float32)
    r = jax.random.normal(kr, (B * S, H), jnp.float32)
    out, down, up = adapter_forward(x, r, ln_w, ln_b, wd, bd, wu, bu)
    jax.block_until_ready((out, down, up))
    ro, rd, ru = reference_forward(x, r, ln_w, ln_b, wd, bd, wu, bu)
    assert jnp.allclose(out, ro, atol=2e-5, rtol=2e-5)
    assert jnp.allclose(down, rd, atol=2e-5, rtol=2e-5)
    assert jnp.allclose(up, ru, atol=2e-5, rtol=2e-5)

    # --- larger ragged case: 2-step grid, no redundant `up` write -------------
    T2 = 1000
    x2 = jax.random.normal(kx2, (T2, H), jnp.float32)
    r2 = jax.random.normal(kr2, (T2, H), jnp.float32)
    out2, down2, up2 = adapter_forward(x2, r2, ln_w, ln_b, wd, bd, wu, bu,
                                       store_up=False)
    jax.block_until_ready((out2, down2))
    ro2, rd2, ru2 = reference_forward(x2, r2, ln_w, ln_b, wd, bd, wu, bu)
    assert up2 is None
    assert jnp.allclose(out2, ro2, atol=2e-5, rtol=2e-5)
    assert jnp.allclose(down2, rd2, atol=2e-5, rtol=2e-5)
    assert jnp.allclose(out2 - r2, ru2, atol=2e-5, rtol=2e-5)   # up == out - residual

    # --- bf16 in/out (halves HBM traffic; kernel upcasts to f32 internally) ---
    xb = x2.astype(jnp.bfloat16)
    rb = r2.astype(jnp.bfloat16)
    outb, downb, upb = adapter_forward(xb, rb, ln_w, ln_b, wd, bd, wu, bu)
    jax.block_until_ready((outb, downb, upb))
    rob, rdb, rub = reference_forward(xb.astype(jnp.float32), rb.astype(jnp.float32),
                                      ln_w, ln_b, wd, bd, wu, bu)
    assert jnp.allclose(outb.astype(jnp.float32), rob, atol=5e-2, rtol=5e-2)
    assert jnp.allclose(downb.astype(jnp.float32), rdb, atol=5e-2, rtol=5e-2)
    assert jnp.allclose(upb.astype(jnp.float32), rub, atol=5e-2, rtol=5e-2)

    print("KERNEL_OK")
</pallas_src>

<mosaic_0001>
module attributes {stable_mosaic.version = 11 : i64} {
  func.func @_adapter_kernel(%arg0: i32, %arg1: memref<16x256xf32, #tpu.memory_space<vmem>>, %arg2: memref<16x256xf32, #tpu.memory_space<vmem>>, %arg3: memref<256x256xf32, #tpu.memory_space<vmem>>, %arg4: memref<256x128xf32, #tpu.memory_space<vmem>>, %arg5: memref<1x128xf32, #tpu.memory_space<vmem>>, %arg6: memref<128x256xf32, #tpu.memory_space<vmem>>, %arg7: memref<1x256xf32, #tpu.memory_space<vmem>>, %arg8: memref<16x256xf32, #tpu.memory_space<vmem>>, %arg9: memref<16x128xf32, #tpu.memory_space<vmem>>, %arg10: memref<16x256xf32, #tpu.memory_space<vmem>>) attributes {dimension_semantics = [#tpu.dimension_semantics<parallel>], iteration_bounds = array<i64: 1>, scalar_prefetch = 0 : i64, scratch_operands = 0 : i64, tpu.core_type = #tpu.core_type<tc>, window_params = [{transform_indices = @transform_0, window_bounds = array<i64: 16, 256>}, {transform_indices = @transform_1, window_bounds = array<i64: 16, 256>}, {pipeline_mode = #tpu.pipeline_mode<synchronous>, transform_indices = @transform_2, window_bounds = array<i64: 256, 256>}, {pipeline_mode = #tpu.pipeline_mode<synchronous>, transform_indices = @transform_3, window_bounds = array<i64: 256, 128>}, {pipeline_mode = #tpu.pipeline_mode<synchronous>, transform_indices = @transform_4, window_bounds = array<i64: 1, 128>}, {pipeline_mode = #tpu.pipeline_mode<synchronous>, transform_indices = @transform_5, window_bounds = array<i64: 128, 256>}, {pipeline_mode = #tpu.pipeline_mode<synchronous>, transform_indices = @transform_6, window_bounds = array<i64: 1, 256>}, {transform_indices = @transform_7, window_bounds = array<i64: 16, 256>}, {transform_indices = @transform_8, window_bounds = array<i64: 16, 128>}, {transform_indices = @transform_9, window_bounds = array<i64: 16, 256>}]} {
    %c0 = arith.constant 0 : index
    %c0_0 = arith.constant 0 : index
    %0 = vector.load %arg1[%c0, %c0_0] : memref<16x256xf32, #tpu.memory_space<vmem>>, vector<16x256xf32>
    %c0_1 = arith.constant 0 : index
    %c0_2 = arith.constant 0 : index
    %1 = vector.load %arg3[%c0_1, %c0_2] : memref<256x256xf32, #tpu.memory_space<vmem>>, vector<256x256xf32>
    %cst = arith.constant dense<0.000000e+00> : vector<16x256xf32>
    %2 = tpu.matmul %0, %1, %cst {dimension_numbers = #tpu.dot_dimension_numbers<[1], [0], [0], [1], [0, 0, 1, 1], [], []>} : vector<16x256xf32>, vector<256x256xf32>, vector<16x256xf32> -> vector<16x256xf32>
    %3 = arith.subf %0, %2 : vector<16x256xf32>
    %4 = arith.mulf %3, %3 : vector<16x256xf32>
    %cst_3 = arith.constant dense<0.000000e+00> : vector<16x256xf32>
    %5 = tpu.matmul %4, %1, %cst_3 {dimension_numbers = #tpu.dot_dimension_numbers<[1], [0], [0], [1], [0, 0, 1, 1], [], []>} : vector<16x256xf32>, vector<256x256xf32>, vector<16x256xf32> -> vector<16x256xf32>
    %cst_4 = arith.constant 9.99999974E-6 : f32
    %6 = vector.broadcast %cst_4 : f32 to vector<16x256xf32>
    %7 = arith.addf %5, %6 : vector<16x256xf32>
    %8 = math.rsqrt %7 : vector<16x256xf32>
    %9 = arith.mulf %3, %8 : vector<16x256xf32>
    %c0_5 = arith.constant 0 : index
    %c0_6 = arith.constant 0 : index
    %10 = vector.load %arg4[%c0_5, %c0_6] : memref<256x128xf32, #tpu.memory_space<vmem>>, vector<256x128xf32>
    %cst_7 = arith.constant dense<0.000000e+00> : vector<16x128xf32>
    %11 = tpu.matmul %9, %10, %cst_7 {dimension_numbers = #tpu.dot_dimension_numbers<[1], [0], [0], [1], [0, 0, 1, 1], [], []>} : vector<16x256xf32>, vector<256x128xf32>, vector<16x128xf32> -> vector<16x128xf32>
    %c0_8 = arith.constant 0 : index
    %c0_9 = arith.constant 0 : index
    %12 = vector.load %arg5[%c0_8, %c0_9] : memref<1x128xf32, #tpu.memory_space<vmem>>, vector<1x128xf32>
    %13 = vector.broadcast %12 : vector<1x128xf32> to vector<16x128xf32>
    %14 = arith.addf %11, %13 : vector<16x128xf32>
    %cst_10 = arith.constant 0.000000e+00 : f32
    %15 = vector.broadcast %cst_10 : f32 to vector<16x128xf32>
    %16 = arith.maximumf %14, %15 : vector<16x128xf32>
    %c0_11 = arith.constant 0 : index
    %c0_12 = arith.constant 0 : index
    %17 = vector.load %arg6[%c0_11, %c0_12] : memref<128x256xf32, #tpu.memory_space<vmem>>, vector<128x256xf32>
    %cst_13 = arith.constant dense<0.000000e+00> : vector<16x256xf32>
    %18 = tpu.matmul %16, %17, %cst_13 {dimension_numbers = #tpu.dot_dimension_numbers<[1], [0], [0], [1], [0, 0, 1, 1], [], []>} : vector<16x128xf32>, vector<128x256xf32>, vector<16x256xf32> -> vector<16x256xf32>
    %c0_14 = arith.constant 0 : index
    %c0_15 = arith.constant 0 : index
    %19 = vector.load %arg7[%c0_14, %c0_15] : memref<1x256xf32, #tpu.memory_space<vmem>>, vector<1x256xf32>
    %20 = vector.broadcast %19 : vector<1x256xf32> to vector<16x256xf32>
    %21 = arith.addf %18, %20 : vector<16x256xf32>
    %c0_16 = arith.constant 0 : index
    %c0_17 = arith.constant 0 : index
    %22 = vector.load %arg2[%c0_16, %c0_17] : memref<16x256xf32, #tpu.memory_space<vmem>>, vector<16x256xf32>
    %23 = arith.addf %21, %22 : vector<16x256xf32>
    %c0_18 = arith.constant 0 : index
    %c0_19 = arith.constant 0 : index
    %24 = vector.load %arg8[%c0_18, %c0_19] : memref<16x256xf32, #tpu.memory_space<vmem>>, vector<16x256xf32>
    tpu.vector_store %arg8[%c0_18, %c0_19], %23 {strides = array<i32>} : memref<16x256xf32, #tpu.memory_space<vmem>>, vector<16x256xf32>,
    %c0_20 = arith.constant 0 : index
    %c0_21 = arith.constant 0 : index
    %25 = vector.load %arg9[%c0_20, %c0_21] : memref<16x128xf32, #tpu.memory_space<vmem>>, vector<16x128xf32>
    tpu.vector_store %arg9[%c0_20, %c0_21], %16 {strides = array<i32>} : memref<16x128xf32, #tpu.memory_space<vmem>>, vector<16x128xf32>,
    %c0_22 = arith.constant 0 : index
    %c0_23 = arith.constant 0 : index
    %26 = vector.load %arg10[%c0_22, %c0_23] : memref<16x256xf32, #tpu.memory_space<vmem>>, vector<16x256xf32>
    tpu.vector_store %arg10[%c0_22, %c0_23], %21 {strides = array<i32>} : memref<16x256xf32, #tpu.memory_space<vmem>>, vector<16x256xf32>,
    return
  }
  func.func @transform_0(%arg0: i32) -> (i32, i32) {
    %c0_i32 = arith.constant 0 : i32
    %c0_i32_0 = arith.constant 0 : i32
    return %arg0, %c0_i32 : i32, i32
  }
  func.func @transform_1(%arg0: i32) -> (i32, i32) {
    %c0_i32 = arith.constant 0 : i32
    %c0_i32_0 = arith.constant 0 : i32
    return %arg0, %c0_i32 : i32, i32
  }
  func.func @transform_2(%arg0: i32) -> (i32, i32) {
    %c0_i32 = arith.constant 0 : i32
    %c0_i32_0 = arith.constant 0 : i32
    %c0_i32_1 = arith.constant 0 : i32
    return %c0_i32, %c0_i32_0 : i32, i32
  }
  func.func @transform_3(%arg0: i32) -> (i32, i32) {
    %c0_i32 = arith.constant 0 : i32
    %c0_i32_0 = arith.constant 0 : i32
    %c0_i32_1 = arith.constant 0 : i32
    return %c0_i32, %c0_i32_0 : i32, i32
  }
  func.func @transform_4(%arg0: i32) -> (i32, i32) {
    %c0_i32 = arith.constant 0 : i32
    %c0_i32_0 = arith.constant 0 : i32
    %c0_i32_1 = arith.constant 0 : i32
    return %c0_i32, %c0_i32_0 : i32, i32
  }
  func.func @transform_5(%arg0: i32) -> (i32, i32) {
    %c0_i32 = arith.constant 0 : i32
    %c0_i32_0 = arith.constant 0 : i32
    %c0_i32_1 = arith.constant 0 : i32
    return %c0_i32, %c0_i32_0 : i32, i32
  }
  func.func @transform_6(%arg0: i32) -> (i32, i32) {
    %c0_i32 = arith.constant 0 : i32
    %c0_i32_0 = arith.constant 0 : i32
    %c0_i32_1 = arith.constant 0 : i32
    return %c0_i32, %c0_i32_0 : i32, i32
  }
  func.func @transform_7(%arg0: i32) -> (i32, i32) {
    %c0_i32 = arith.constant 0 : i32
    %c0_i32_0 = arith.constant 0 : i32
    return %arg0, %c0_i32 : i32, i32
  }
  func.func @transform_8(%arg0: i32) -> (i32, i32) {
    %c0_i32 = arith.constant 0 : i32
    %c0_i32_0 = arith.constant 0 : i32
    return %arg0, %c0_i32 : i32, i32
  }
  func.func @transform_9(%arg0: i32) -> (i32, i32) {
    %c0_i32 = arith.constant 0 : i32
    %c0_i32_0 = arith.constant 0 : i32
    return %arg0, %c0_i32 : i32, i32
  }
}

</mosaic_0001>

<bundles_post_ra>
// kernel: adapter_forward.1
= control target key start
LH: loop header
LB: loop body
LE: loop exit
PB: predicated region body
PF: predicated region fallthrough
CT: control target
= control target key end

     0   :  { %s1101_s2 = inlined_call_operand.vmem [shape: f32[256,256], index: 2, kind: input, shape index: {}]   ;;  %s1102_s0 = inlined_call_operand.vmem [shape: f32[16,256], index: 0, kind: input, shape index: {}]   ;;  %s1103_s3 = inlined_call_operand.vmem [shape: f32[256,128], index: 3, kind: input, shape index: {}]   ;;  %s1104_s5 = inlined_call_operand.vmem [shape: f32[128,256], index: 5, kind: input, shape index: {}]   ;;  %s1105_s4 = inlined_call_operand.vmem [shape: f32[1,128], index: 4, kind: input, shape index: {}]   ;;  %s1106_s8 = inlined_call_operand.vmem [shape: f32[16,128], index: 8, kind: output, shape index: {1}]   ;;  %s1107_s6 = inlined_call_operand.vmem [shape: f32[1,256], index: 6, kind: input, shape index: {}]   ;;  %s1108_s1 = inlined_call_operand.vmem [shape: f32[16,256], index: 1, kind: input, shape index: {}]   ;;  %s1109_s9 = inlined_call_operand.vmem [shape: f32[16,256], index: 9, kind: output, shape index: {2}]   ;;  %s1110_s7 = inlined_call_operand.vmem [shape: f32[16,256], index: 7, kind: output, shape index: {0}]  }
   0x1   :  { %v64_v0 = vld [vmem:[%s1101_s2 + $0xf8] sm:$0xff]  ;;  %v63_v1 = vld [vmem:[%s1101_s2 + $0xf0] sm:$0xff]  ;;  %v62_v2 = vld [vmem:[%s1101_s2 + $0xe8] sm:$0xff] }
   0x2   :  { %97 = vmatprep.subr.mxu0 %v64_v0  ;;  %v61_v3 = vld [vmem:[%s1101_s2 + $0xe0] sm:$0xff]  ;;  %182 = vmatprep.subr.mxu1 %v64_v0  ;;  %v60_v4 = vld [vmem:[%s1101_s2 + $0xd8] sm:$0xff]  ;;  %v59_v5 = vld [vmem:[%s1101_s2 + $0xd0] sm:$0xff] }
   0x3   :  { %98 = vmatpush1.msra.mxu0 %v63_v1  ;;  %183 = vmatpush1.msra.mxu1 %v63_v1  ;;  %v58_v6 = vld [vmem:[%s1101_s2 + $0xc8] sm:$0xff]  ;;  %v57_v7 = vld [vmem:[%s1101_s2 + $0xc0] sm:$0xff]  ;;  %v56_v8 = vld [vmem:[%s1101_s2 + $0xb8] sm:$0xff] }
   0x4   :  { %99 = vmatprep.subr.mxu0 %v62_v2  ;;  %184 = vmatprep.subr.mxu1 %v62_v2  ;;  %v55_v9 = vld [vmem:[%s1101_s2 + $0xb0] sm:$0xff]  ;;  %v54_v10 = vld [vmem:[%s1101_s2 + $0xa8] sm:$0xff]  ;;  %v53_v11 = vld [vmem:[%s1101_s2 + $0xa0] sm:$0xff] }
   0x5   :  { %100 = vmatpush1.msra.mxu0 %v61_v3  ;;  %185 = vmatpush1.msra.mxu1 %v61_v3  ;;  %v52_v12 = vld [vmem:[%s1101_s2 + $0x98] sm:$0xff]  ;;  %v51_v13 = vld [vmem:[%s1101_s2 + $0x90] sm:$0xff]  ;;  %v50_v14 = vld [vmem:[%s1101_s2 + $0x88] sm:$0xff] }
   0x6   :  { %101 = vmatprep.subr.mxu0 %v60_v4  ;;  %186 = vmatprep.subr.mxu1 %v60_v4  ;;  %v49_v15 = vld [vmem:[%s1101_s2 + $0x80] sm:$0xff]  ;;  %v48_v16 = vld [vmem:[%s1101_s2 + $0x78] sm:$0xff]  ;;  %v47_v17 = vld [vmem:[%s1101_s2 + $0x70] sm:$0xff] }
   0x7   :  { %102 = vmatpush1.msra.mxu0 %v59_v5  ;;  %187 = vmatpush1.msra.mxu1 %v59_v5  ;;  %v46_v18 = vld [vmem:[%s1101_s2 + $0x68] sm:$0xff]  ;;  %v45_v19 = vld [vmem:[%s1101_s2 + $0x60] sm:$0xff]  ;;  %v44_v20 = vld [vmem:[%s1101_s2 + $0x58] sm:$0xff] }
   0x8   :  { %103 = vmatprep.subr.mxu0 %v58_v6  ;;  %188 = vmatprep.subr.mxu1 %v58_v6  ;;  %v43_v21 = vld [vmem:[%s1101_s2 + $0x50] sm:$0xff]  ;;  %v42_v22 = vld [vmem:[%s1101_s2 + $0x48] sm:$0xff]  ;;  %v41_v23 = vld [vmem:[%s1101_s2 + $0x40] sm:$0xff] }
   0x9   :  { %104 = vmatpush1.msra.mxu0 %v57_v7  ;;  %189 = vmatpush1.msra.mxu1 %v57_v7  ;;  %v708_v24 = vld [vmem:[%s1102_s0 + $0x8] sm:$0xff]  ;;  %v40_v25 = vld [vmem:[%s1101_s2 + $0x38] sm:$0xff]  ;;  %v39_v26 = vld [vmem:[%s1101_s2 + $0x30] sm:$0xff] }
   0xa   :  { %105 = vmatprep.subr.mxu0 %v56_v8  ;;  %190 = vmatprep.subr.mxu1 %v56_v8  ;;  %v38_v27 = vld [vmem:[%s1101_s2 + $0x28] sm:$0xff]  ;;  %v37_v28 = vld [vmem:[%s1101_s2 + $0x20] sm:$0xff]  ;;  %v36_v29 = vld [vmem:[%s1101_s2 + $0x18] sm:$0xff] }
   0xb   :  { %106 = vmatpush1.msra.mxu0 %v55_v9  ;;  %191 = vmatpush1.msra.mxu1 %v55_v9  ;;  %v35_v30 = vld [vmem:[%s1101_s2 + $0x10] sm:$0xff]  ;;  %v34_v31 = vld [vmem:[%s1101_s2 + $0x8] sm:$0xff]  ;;  %v33_v32 = vld [vmem:[%s1101_s2] sm:$0xff] }
   0xc   :  { %107 = vmatprep.subr.mxu0 %v54_v10  ;;  %192 = vmatprep.subr.mxu1 %v54_v10  ;;  %v96_v33 = vld [vmem:[%s1101_s2 + $0x1f8] sm:$0xff]  ;;  %v95_v34 = vld [vmem:[%s1101_s2 + $0x1f0] sm:$0xff]  ;;  %v94_v35 = vld [vmem:[%s1101_s2 + $0x1e8] sm:$0xff] }
   0xd   :  { %108 = vmatpush1.msra.mxu0 %v53_v11  ;;  %193 = vmatpush1.msra.mxu1 %v53_v11  ;;  %v93_v36 = vld [vmem:[%s1101_s2 + $0x1e0] sm:$0xff]  ;;  %v92_v37 = vld [vmem:[%s1101_s2 + $0x1d8] sm:$0xff]  ;;  %v91_v38 = vld [vmem:[%s1101_s2 + $0x1d0] sm:$0xff] }
   0xe   :  { %109 = vmatprep.subr.mxu0 %v52_v12  ;;  %194 = vmatprep.subr.mxu1 %v52_v12  ;;  %v90_v39 = vld [vmem:[%s1101_s2 + $0x1c8] sm:$0xff]  ;;  %v89_v40 = vld [vmem:[%s1101_s2 + $0x1c0] sm:$0xff]  ;;  %v88_v41 = vld [vmem:[%s1101_s2 + $0x1b8] sm:$0xff] }
   0xf   :  { %110 = vmatpush1.msra.mxu0 %v51_v13  ;;  %195 = vmatpush1.msra.mxu1 %v51_v13  ;;  %v87_v42 = vld [vmem:[%s1101_s2 + $0x1b0] sm:$0xff]  ;;  %v86_v43 = vld [vmem:[%s1101_s2 + $0x1a8] sm:$0xff]  ;;  %v85_v44 = vld [vmem:[%s1101_s2 + $0x1a0] sm:$0xff] }
  0x10   :  { %111 = vmatprep.subr.mxu0 %v50_v14  ;;  %196 = vmatprep.subr.mxu1 %v50_v14  ;;  %v84_v45 = vld [vmem:[%s1101_s2 + $0x198] sm:$0xff]  ;;  %v83_v46 = vld [vmem:[%s1101_s2 + $0x190] sm:$0xff]  ;;  %v82_v47 = vld [vmem:[%s1101_s2 + $0x188] sm:$0xff] }
  0x11   :  { %112 = vmatpush1.msra.mxu0 %v49_v15  ;;  %197 = vmatpush1.msra.mxu1 %v49_v15  ;;  %v81_v48 = vld [vmem:[%s1101_s2 + $0x180] sm:$0xff]  ;;  %v80_v49 = vld [vmem:[%s1101_s2 + $0x178] sm:$0xff]  ;;  %v79_v50 = vld [vmem:[%s1101_s2 + $0x170] sm:$0xff] }
  0x12   :  { %113 = vmatprep.subr.mxu0 %v48_v16  ;;  %198 = vmatprep.subr.mxu1 %v48_v16  ;;  %v78_v51 = vld [vmem:[%s1101_s2 + $0x168] sm:$0xff]  ;;  %v77_v52 = vld [vmem:[%s1101_s2 + $0x160] sm:$0xff]  ;;  %v76_v53 = vld [vmem:[%s1101_s2 + $0x158] sm:$0xff] }
  0x13   :  { %114 = vmatpush1.msra.mxu0 %v47_v17  ;;  %199 = vmatpush1.msra.mxu1 %v47_v17  ;;  %v75_v54 = vld [vmem:[%s1101_s2 + $0x150] sm:$0xff]  ;;  %v74_v55 = vld [vmem:[%s1101_s2 + $0x148] sm:$0xff]  ;;  %v73_v56 = vld [vmem:[%s1101_s2 + $0x140] sm:$0xff] }
  0x14   :  { %115 = vmatprep.subr.mxu0 %v46_v18  ;;  %200 = vmatprep.subr.mxu1 %v46_v18  ;;  %v72_v57 = vld [vmem:[%s1101_s2 + $0x138] sm:$0xff]  ;;  %v71_v58 = vld [vmem:[%s1101_s2 + $0x130] sm:$0xff]  ;;  %v70_v59 = vld [vmem:[%s1101_s2 + $0x128] sm:$0xff] }
  0x15   :  { %116 = vmatpush1.msra.mxu0 %v45_v19  ;;  %201 = vmatpush1.msra.mxu1 %v45_v19  ;;  %v69_v60 = vld [vmem:[%s1101_s2 + $0x120] sm:$0xff]  ;;  %v68_v61 = vld [vmem:[%s1101_s2 + $0x118] sm:$0xff]  ;;  %v67_v62 = vld [vmem:[%s1101_s2 + $0x110] sm:$0xff] }
  0x16   :  { %117 = vmatprep.subr.mxu0 %v44_v20  ;;  %202 = vmatprep.subr.mxu1 %v44_v20  ;;  %v66_v63 = vld [vmem:[%s1101_s2 + $0x108] sm:$0xff]  ;;  %v65_v0 = vld [vmem:[%s1101_s2 + $0x100] sm:$0xff]  ;;  %v32_v2 = vld [vmem:[%s1102_s0 + $0x18] sm:$0xff] }
  0x17   :  { %118 = vmatpush1.msra.mxu0 %v43_v21  ;;  %161 = vmatprep.mubr.f32.mxu0 %v708_v24  ;;  %v29_v1 = vld [vmem:[%s1102_s0] sm:$0xff]  ;;  %v31_v3 = vld [vmem:[%s1102_s0 + $0x10] sm:$0xff]  ;;  %v298_v4 = vld [vmem:[%s1103_s3 + $0xf8] sm:$0xff] }
  0x18   :  { %119 = vmatprep.subr.mxu0 %v42_v22  ;;  %203 = vmatpush1.msra.mxu1 %v43_v21  ;;  %v282_v5 = vld [vmem:[%s1103_s3 + $0x78] sm:$0xff]  ;;  %v297_v6 = vld [vmem:[%s1103_s3 + $0xf0] sm:$0xff]  ;;  %v296_v8 = vld [vmem:[%s1103_s3 + $0xe8] sm:$0xff] }
  0x19   :  { %120 = vmatpush1.msra.mxu0 %v41_v23  ;;  %204 = vmatprep.subr.mxu1 %v42_v22  ;;  %v281_v7 = vld [vmem:[%s1103_s3 + $0x70] sm:$0xff]  ;;  %v280_v9 = vld [vmem:[%s1103_s3 + $0x68] sm:$0xff]  ;;  %v295_v10 = vld [vmem:[%s1103_s3 + $0xe0] sm:$0xff] }
  0x1a   :  { %121 = vmatprep.subr.mxu0 %v40_v25  ;;  %205 = vmatpush1.msra.mxu1 %v41_v23  ;;  %v279_v11 = vld [vmem:[%s1103_s3 + $0x60] sm:$0xff]  ;;  %v294_v12 = vld [vmem:[%s1103_s3 + $0xd8] sm:$0xff] }
  0x1b   :  { %122 = vmatpush1.msra.mxu0 %v39_v26  ;;  %206 = vmatprep.subr.mxu1 %v40_v25  ;;  %v278_v13 = vld [vmem:[%s1103_s3 + $0x58] sm:$0xff] }
  0x1c   :  { %123 = vmatprep.subr.mxu0 %v38_v27  ;;  %207 = vmatpush1.msra.mxu1 %v39_v26  ;;  %v293_v26 = vld [vmem:[%s1103_s3 + $0xd0] sm:$0xff] }
  0x1d   :  { %124 = vmatpush1.msra.mxu0 %v37_v28  ;;  %208 = vmatprep.subr.mxu1 %v38_v27  ;;  %v277_v27 = vld [vmem:[%s1103_s3 + $0x50] sm:$0xff] }
  0x1e   :  { %125 = vmatprep.subr.mxu0 %v36_v29  ;;  %209 = vmatpush1.msra.mxu1 %v37_v28  ;;  %v292_v28 = vld [vmem:[%s1103_s3 + $0xc8] sm:$0xff] }
  0x1f   :  { %126 = vmatpush1.msra.mxu0 %v35_v30  ;;  %210 = vmatprep.subr.mxu1 %v36_v29  ;;  %v276_v29 = vld [vmem:[%s1103_s3 + $0x48] sm:$0xff] }
  0x20   :  { %127 = vmatprep.subr.mxu0 %v34_v31  ;;  %211 = vmatpush1.msra.mxu1 %v35_v30  ;;  %v291_v30 = vld [vmem:[%s1103_s3 + $0xc0] sm:$0xff] }
  0x21   :  { %128 = vmatpush1.msra.mxu0 %v33_v32  ;;  %212 = vmatprep.subr.mxu1 %v34_v31  ;;  %v275_v31 = vld [vmem:[%s1103_s3 + $0x40] sm:$0xff] }
  0x22   :  { %129 = vmatprep.subr.mxu0 %v96_v33  ;;  %213 = vmatpush1.msra.mxu1 %v33_v32  ;;  %v290_v32 = vld [vmem:[%s1103_s3 + $0xb8] sm:$0xff] }
  0x23   :  { %130 = vmatpush2.msra.mxu0 %v95_v34  ;;  %214 = vmatprep.subr.mxu1 %v96_v33  ;;  %v274_v33 = vld [vmem:[%s1103_s3 + $0x38] sm:$0xff] }
  0x24   :  { %131 = vmatprep.subr.mxu0 %v94_v35  ;;  %215 = vmatpush2.msra.mxu1 %v95_v34  ;;  %v289_v34 = vld [vmem:[%s1103_s3 + $0xb0] sm:$0xff] }
  0x25   :  { %132 = vmatpush2.msra.mxu0 %v93_v36  ;;  %216 = vmatprep.subr.mxu1 %v94_v35  ;;  %v273_v35 = vld [vmem:[%s1103_s3 + $0x30] sm:$0xff] }
  0x26   :  { %133 = vmatprep.subr.mxu0 %v92_v37  ;;  %217 = vmatpush2.msra.mxu1 %v93_v36  ;;  %v288_v36 = vld [vmem:[%s1103_s3 + $0xa8] sm:$0xff] }
  0x27   :  { %134 = vmatpush2.msra.mxu0 %v91_v38  ;;  %218 = vmatprep.subr.mxu1 %v92_v37  ;;  %v272_v37 = vld [vmem:[%s1103_s3 + $0x28] sm:$0xff] }
  0x28   :  { %135 = vmatprep.subr.mxu0 %v90_v39  ;;  %219 = vmatpush2.msra.mxu1 %v91_v38  ;;  %v287_v38 = vld [vmem:[%s1103_s3 + $0xa0] sm:$0xff] }
  0x29   :  { %136 = vmatpush2.msra.mxu0 %v89_v40  ;;  %220 = vmatprep.subr.mxu1 %v90_v39  ;;  %v271_v39 = vld [vmem:[%s1103_s3 + $0x20] sm:$0xff] }
  0x2a   :  { %137 = vmatprep.subr.mxu0 %v88_v41  ;;  %221 = vmatpush2.msra.mxu1 %v89_v40  ;;  %v286_v40 = vld [vmem:[%s1103_s3 + $0x98] sm:$0xff] }
  0x2b   :  { %138 = vmatpush2.msra.mxu0 %v87_v42  ;;  %222 = vmatprep.subr.mxu1 %v88_v41  ;;  %v270_v41 = vld [vmem:[%s1103_s3 + $0x18] sm:$0xff] }
  0x2c   :  { %139 = vmatprep.subr.mxu0 %v86_v43  ;;  %223 = vmatpush2.msra.mxu1 %v87_v42  ;;  %v285_v42 = vld [vmem:[%s1103_s3 + $0x90] sm:$0xff] }
  0x2d   :  { %140 = vmatpush2.msra.mxu0 %v85_v44  ;;  %224 = vmatprep.subr.mxu1 %v86_v43  ;;  %v269_v43 = vld [vmem:[%s1103_s3 + $0x10] sm:$0xff] }
  0x2e   :  { %141 = vmatprep.subr.mxu0 %v84_v45  ;;  %225 = vmatpush2.msra.mxu1 %v85_v44  ;;  %v284_v44 = vld [vmem:[%s1103_s3 + $0x88] sm:$0xff] }
  0x2f   :  { %142 = vmatpush2.msra.mxu0 %v83_v46  ;;  %226 = vmatprep.subr.mxu1 %v84_v45  ;;  %v268_v45 = vld [vmem:[%s1103_s3 + $0x8] sm:$0xff] }
  0x30   :  { %143 = vmatprep.subr.mxu0 %v82_v47  ;;  %227 = vmatpush2.msra.mxu1 %v83_v46  ;;  %v283_v46 = vld [vmem:[%s1103_s3 + $0x80] sm:$0xff] }
  0x31   :  { %144 = vmatpush2.msra.mxu0 %v81_v48  ;;  %228 = vmatprep.subr.mxu1 %v82_v47  ;;  %v267_v47 = vld [vmem:[%s1103_s3] sm:$0xff] }
  0x32   :  { %145 = vmatprep.subr.mxu0 %v80_v49  ;;  %229 = vmatpush2.msra.mxu1 %v81_v48  ;;  %v414_v48 = vld [vmem:[%s1104_s5 + $0xf8] sm:$0xff] }
  0x33   :  { %146 = vmatpush2.msra.mxu0 %v79_v50  ;;  %230 = vmatprep.subr.mxu1 %v80_v49  ;;  %v413_v49 = vld [vmem:[%s1104_s5 + $0xf0] sm:$0xff] }
  0x34   :  { %147 = vmatprep.subr.mxu0 %v78_v51  ;;  %231 = vmatpush2.msra.mxu1 %v79_v50  ;;  %v412_v50 = vld [vmem:[%s1104_s5 + $0xe8] sm:$0xff] }
  0x35   :  { %148 = vmatpush2.msra.mxu0 %v77_v52  ;;  %232 = vmatprep.subr.mxu1 %v78_v51  ;;  %v411_v51 = vld [vmem:[%s1104_s5 + $0xe0] sm:$0xff] }
  0x36   :  { %149 = vmatprep.subr.mxu0 %v76_v53  ;;  %233 = vmatpush2.msra.mxu1 %v77_v52  ;;  %v410_v52 = vld [vmem:[%s1104_s5 + $0xd8] sm:$0xff] }
  0x37   :  { %150 = vmatpush2.msra.mxu0 %v75_v54  ;;  %234 = vmatprep.subr.mxu1 %v76_v53  ;;  %v409_v53 = vld [vmem:[%s1104_s5 + $0xd0] sm:$0xff] }
  0x38   :  { %151 = vmatprep.subr.mxu0 %v74_v55  ;;  %235 = vmatpush2.msra.mxu1 %v75_v54  ;;  %v408_v54 = vld [vmem:[%s1104_s5 + $0xc8] sm:$0xff] }
  0x39   :  { %152 = vmatpush2.msra.mxu0 %v73_v56  ;;  %236 = vmatprep.subr.mxu1 %v74_v55  ;;  %v407_v55 = vld [vmem:[%s1104_s5 + $0xc0] sm:$0xff] }
  0x3a   :  { %153 = vmatprep.subr.mxu0 %v72_v57  ;;  %237 = vmatpush2.msra.mxu1 %v73_v56  ;;  %v406_v56 = vld [vmem:[%s1104_s5 + $0xb8] sm:$0xff] }
  0x3b   :  { %154 = vmatpush2.msra.mxu0 %v71_v58  ;;  %238 = vmatprep.subr.mxu1 %v72_v57  ;;  %v405_v57 = vld [vmem:[%s1104_s5 + $0xb0] sm:$0xff] }
  0x3c   :  { %155 = vmatprep.subr.mxu0 %v70_v59  ;;  %239 = vmatpush2.msra.mxu1 %v71_v58  ;;  %v404_v58 = vld [vmem:[%s1104_s5 + $0xa8] sm:$0xff] }
  0x3d   :  { %156 = vmatpush2.msra.mxu0 %v69_v60  ;;  %240 = vmatprep.subr.mxu1 %v70_v59  ;;  %v403_v59 = vld [vmem:[%s1104_s5 + $0xa0] sm:$0xff] }
  0x3e   :  { %157 = vmatprep.subr.mxu0 %v68_v61  ;;  %241 = vmatpush2.msra.mxu1 %v69_v60  ;;  %v402_v60 = vld [vmem:[%s1104_s5 + $0x98] sm:$0xff] }
  0x3f   :  { %158 = vmatpush2.msra.mxu0 %v67_v62  ;;  %242 = vmatprep.subr.mxu1 %v68_v61  ;;  %v401_v61 = vld [vmem:[%s1104_s5 + $0x90] sm:$0xff] }
  0x40   :  { %159 = vmatprep.subr.mxu0 %v66_v63  ;;  %243 = vmatpush2.msra.mxu1 %v67_v62  ;;  %v400_v62 = vld [vmem:[%s1104_s5 + $0x88] sm:$0xff] }
  0x41   :  { %160 = vmatpush2.msra.mxu0 %v65_v0  ;;  %244 = vmatprep.subr.mxu1 %v66_v63  ;;  %v399_v63 = vld [vmem:[%s1104_s5 + $0x80] sm:$0xff] }
  0x42   :  { %162 = vmatmul.mubr.f32.vlgmr.msra.gmra.mxu0 %v29_v1  ;;  %245 = vmatpush2.msra.mxu1 %v65_v0  ;;  %v398_v0 = vld [vmem:[%s1104_s5 + $0x78] sm:$0xff] }
  0x43   :  { %167 = vmatprep.mubr.f32.mxu0 %v32_v2  ;;  %535 = vmatprep.subr.mxu0 %v298_v4  ;;  %v394_v4 = vld [vmem:[%s1104_s5 + $0x58] sm:$0xff] }
  0x44   :  { %536 = vmatpush3.msra.mxu0 %v282_v5  ;;  %427 = vmatprep.subr.mxu1 %v414_v48  ;;  %v393_v5 = vld [vmem:[%s1104_s5 + $0x50] sm:$0xff] }
  0x45   :  { %537 = vmatprep.subr.mxu0 %v297_v6  ;;  %v392_v6 = vld [vmem:[%s1104_s5 + $0x48] sm:$0xff] }
  0x46   :  { %168 = vmatmul.mubr.f32.gmra.mxu0 %v31_v3 }
  0x47   :  { %538 = vmatpush3.msra.mxu0 %v281_v7 }
  0x48   :  { %539 = vmatprep.subr.mxu0 %v296_v8 }
  0x49   :  { %540 = vmatpush3.msra.mxu0 %v280_v9 }
  0x4a   :  { %541 = vmatprep.subr.mxu0 %v295_v10 }
  0x4b   :  { %542 = vmatpush3.msra.mxu0 %v279_v11 }
  0x4c   :  { %543 = vmatprep.subr.mxu0 %v294_v12 }
  0x4d   :  { %544 = vmatpush3.msra.mxu0 %v278_v13 }
  0x4e   :  { %545 = vmatprep.subr.mxu0 %v293_v26 }
  0x4f   :  { %546 = vmatpush3.msra.mxu0 %v277_v27  ;;  %v391_v27 = vld [vmem:[%s1104_s5 + $0x40] sm:$0xff] }
  0x50   :  { %547 = vmatprep.subr.mxu0 %v292_v28  ;;  %v386_v28 = vld [vmem:[%s1104_s5 + $0x18] sm:$0xff] }
  0x51   :  { %548 = vmatpush3.msra.mxu0 %v276_v29  ;;  %v385_v29 = vld [vmem:[%s1104_s5 + $0x10] sm:$0xff] }
  0x52   :  { %549 = vmatprep.subr.mxu0 %v291_v30  ;;  %v384_v30 = vld [vmem:[%s1104_s5 + $0x8] sm:$0xff] }
  0x53   :  { %550 = vmatpush3.msra.mxu0 %v275_v31  ;;  %v383_v31 = vld [vmem:[%s1104_s5] sm:$0xff] }
  0x54   :  { %551 = vmatprep.subr.mxu0 %v290_v32  ;;  %v582_v32 = vmov 0.0  }
  0x55   :  { %552 = vmatpush3.msra.mxu0 %v274_v33 }
  0x56   :  { %553 = vmatprep.subr.mxu0 %v289_v34  ;;  %v534_v34 = vld [vmem:[%s1105_s4] ss:$0 sm:$0xff] }
  0x57   :  { %554 = vmatpush3.msra.mxu0 %v273_v35 }
  0x58   :  { %555 = vmatprep.subr.mxu0 %v288_v36 }
  0x59   :  { %556 = vmatpush3.msra.mxu0 %v272_v37 }
  0x5a   :  { %557 = vmatprep.subr.mxu0 %v287_v38 }
  0x5b   :  { %558 = vmatpush3.msra.mxu0 %v271_v39 }
  0x5c   :  { %559 = vmatprep.subr.mxu0 %v286_v40 }
  0x5d   :  { %560 = vmatpush3.msra.mxu0 %v270_v41 }
  0x5e   :  { %561 = vmatprep.subr.mxu0 %v285_v42 }
  0x5f   :  { %562 = vmatpush3.msra.mxu0 %v269_v43 }
  0x60   :  { %563 = vmatprep.subr.mxu0 %v284_v44  ;;  %v417_v44 = vlaneseq }
  0x61   :  { %564 = vmatpush3.msra.mxu0 %v268_v45 }
  0x62   :  { %565 = vmatprep.subr.mxu0 %v283_v46  ;;  %v418_v45 = vshrl.u32 %v417_v44, 7 }
  0x63   :  { %566 = vmatpush3.msra.mxu0 %v267_v47  ;;  %v415_v47 = vld [vmem:[%s1107_s6] sm:$0x3] }
  0x64   :  { %v419_v46 = vsub.s32 0, %v418_v45  ;;  %v423_v48 = vsub.s32 1, %v418_v45 }
 0x102   :  { %v163_v14 = vpop.f32.mrf.mxu0 }
 0x103   :  { %v870_v15 = vsub.f32 %v29_v1, %v163_v14  ;;  %v397_v1 = vld [vmem:[%s1104_s5 + $0x70] sm:$0xff] }
 0x104   :  { %v165_v16 = vpop.f32.mrf.mxu0 }
 0x105   :  { %v873_v17 = vsub.f32 %v708_v24, %v165_v16  ;;  %v178_v20 = vmul.f32 %v870_v15, %v870_v15 }
 0x106   :  { %v169_v18 = vpop.f32.mrf.mxu0 }
 0x107   :  { %v179_v19 = vmul.f32 %v873_v17, %v873_v17  ;;  %v879_v21 = vsub.f32 %v31_v3, %v169_v18  ;;  %v395_v3 = vld [vmem:[%s1104_s5 + $0x60] sm:$0xff] }
 0x108   :  { %v171_v22 = vpop.f32.mrf.mxu0 }
 0x109   :  { %v881_v23 = vsub.f32 %v32_v2, %v171_v22  ;;  %246 = vmatprep.mubr.f32.mxu1 %v179_v19  ;;  %v180_v24 = vmul.f32 %v879_v21, %v879_v21  ;;  %v396_v2 = vld [vmem:[%s1104_s5 + $0x68] sm:$0xff] }
 0x10a   :  { %247 = vmatmul.mubr.f32.vlgmr.msra.gmra.mxu1 %v178_v20 }
 0x10b   :  { %v181_v25 = vmul.f32 %v881_v23, %v881_v23  ;;  %428 = vmatpush1.msra.mxu1 %v413_v49  ;;  %v420_v49 = vrot.slane %v415_v47, %v419_v46 }
 0x10c   :  { %429 = vmatprep.subr.mxu1 %v412_v50  ;;  %v424_v50 = vrot.slane %v415_v47, %v423_v48 }
 0x10d   :  { %252 = vmatprep.mubr.f32.mxu1 %v181_v25  ;;  %430 = vmatpush1.msra.mxu1 %v411_v51 }
 0x10e   :  { %253 = vmatmul.mubr.f32.gmra.mxu1 %v180_v24  ;;  %431 = vmatprep.subr.mxu1 %v410_v52  ;;  %v504_v52 = vld [vmem:[%s1108_s1] sm:$0xff] }
 0x10f   :  { %432 = vmatpush1.msra.mxu1 %v409_v53  ;;  %491 = vmatprep.mubr.f32.mxu1 %v582_v32 }
 0x110   :  { %433 = vmatprep.subr.mxu1 %v408_v54 }
 0x111   :  { %434 = vmatpush1.msra.mxu1 %v407_v55  ;;  %v505_v55 = vld [vmem:[%s1108_s1 + $0x8] sm:$0xff] }
 0x112   :  { %435 = vmatprep.subr.mxu1 %v406_v56 }
 0x113   :  { %436 = vmatpush1.msra.mxu1 %v405_v57 }
 0x114   :  { %437 = vmatprep.subr.mxu1 %v404_v58 }
 0x115   :  { %438 = vmatpush1.msra.mxu1 %v403_v59  ;;  %v506_v59 = vld [vmem:[%s1108_s1 + $0x10] sm:$0xff] }
 0x116   :  { %439 = vmatprep.subr.mxu1 %v402_v60 }
 0x117   :  { %440 = vmatpush1.msra.mxu1 %v401_v61 }
 0x118   :  { %441 = vmatprep.subr.mxu1 %v400_v62 }
 0x119   :  { %442 = vmatpush1.msra.mxu1 %v399_v63  ;;  %v507_v63 = vld [vmem:[%s1108_s1 + $0x18] sm:$0xff] }
 0x11a   :  { %443 = vmatprep.subr.mxu1 %v398_v0 }
 0x11b   :  { %444 = vmatpush1.msra.mxu1 %v397_v1 }
 0x11c   :  { %445 = vmatprep.subr.mxu1 %v396_v2 }
 0x11d   :  { %446 = vmatpush1.msra.mxu1 %v395_v3 }
 0x11e   :  { %447 = vmatprep.subr.mxu1 %v394_v4 }
 0x11f   :  { %448 = vmatpush1.msra.mxu1 %v393_v5 }
 0x120   :  { %449 = vmatprep.subr.mxu1 %v392_v6 }
 0x121   :  { %450 = vmatpush1.msra.mxu1 %v391_v27 }
 0x1ca   :  { %v248_v7 = vpop.f32.mrf.mxu1 }
 0x1cb   :  { %v249_v8 = vadd.f32 1e-05, %v248_v7 }
 0x1cc   :  { %v250_v9 = vpop.f32.mrf.mxu1 }
 0x1cd   :  { %v251_v10 = vadd.f32 1e-05, %v250_v9  ;;  %574 = vrsqrt.f32 %v249_v8 }
 0x1ce   :  { %v254_v11 = vpop.f32.mrf.mxu1 }
 0x1cf   :  { %576 = vrsqrt.f32 %v251_v10  ;;  %v255_v12 = vadd.f32 1e-05, %v254_v11 }
 0x1d0   :  { %v256_v13 = vpop.f32.mrf.mxu1 }
 0x1d1   :  { %v257_v14 = vadd.f32 1e-05, %v256_v13  ;;  %578 = vrsqrt.f32 %v255_v12 }
 0x1d3   :  { %580 = vrsqrt.f32 %v257_v14 }
 0x1da   :  { %v575_v16 = vpop.eup %574 }
 0x1db   :  { %v263_v20 = vmul.f32 %v575_v16, %v870_v15  ;;  %v389_v15 = vld [vmem:[%s1104_s5 + $0x30] sm:$0xff] }
 0x1dc   :  { %v577_v18 = vpop.eup %576 }
 0x1dd   :  { %v264_v19 = vmul.f32 %v577_v18, %v873_v17  ;;  %v390_v17 = vld [vmem:[%s1104_s5 + $0x38] sm:$0xff] }
 0x1de   :  { %v579_v22 = vpop.eup %578  ;;  %451 = vmatprep.subr.mxu1 %v390_v17 }
 0x1df   :  { %370 = vmatprep.mubr.f32.mxu0 %v264_v19  ;;  %v265_v26 = vmul.f32 %v579_v22, %v879_v21  ;;  %452 = vmatpush1.msra.mxu1 %v389_v15  ;;  %v388_v21 = vld [vmem:[%s1104_s5 + $0x28] sm:$0xff] }
 0x1e0   :  { %v581_v25 = vpop.eup %580  ;;  %371 = vmatmul.mubr.f32.vlgmr.msra.gmra.mxu0 %v263_v20  ;;  %453 = vmatprep.subr.mxu1 %v388_v21 }
 0x1e1   :  { %v266_v24 = vmul.f32 %v581_v25, %v881_v23  ;;  %v387_v23 = vld [vmem:[%s1104_s5 + $0x20] sm:$0xff] }
 0x1e2   :  { %454 = vmatpush1.msra.mxu1 %v387_v23 }
 0x1e3   :  { %375 = vmatprep.mubr.f32.mxu0 %v266_v24  ;;  %455 = vmatprep.subr.mxu1 %v386_v28 }
 0x1e4   :  { %376 = vmatmul.mubr.f32.gmra.mxu0 %v265_v26  ;;  %456 = vmatpush1.msra.mxu1 %v385_v29 }
 0x1e5   :  { %457 = vmatprep.subr.mxu1 %v384_v30 }
 0x1e6   :  { %458 = vmatpush1.msra.mxu1 %v383_v31 }
 0x2a0   :  { %v567_v33 = vpop.f32.mrf.mxu0 }
 0x2a2   :  { %v568_v35 = vpop.f32.mrf.mxu0 }
 0x2a3   :  { %v569_v36 = vadd.f32 %v568_v35, %v567_v33 }
 0x2a4   :  { %v570_v37 = vpop.f32.mrf.mxu0 }
 0x2a5   :  { %v373_v38 = vadd.f32 %v569_v36, %v534_v34 }
 0x2a6   :  { %v571_v39 = vpop.f32.mrf.mxu0 }
 0x2a7   :  { %v381_v40 = vmax.f32 %v373_v38, 0.0  ;;  %v572_v41 = vadd.f32 %v571_v39, %v570_v37 }
 0x2a9   :  { %516 = vst [vmem:[%s1106_s8] sm:$0xff] %v381_v40  ;;  %v378_v42 = vadd.f32 %v572_v41, %v534_v34  ;;  %492 = vmatmul.mubr.f32.vlgmr.msra.gmra.mxu1 %v381_v40 }
 0x2aa   :  { %497 = vmatprep.mubr.f32.mxu1 %v582_v32 }
 0x2ab   :  { %v382_v43 = vmax.f32 %v378_v42, 0.0 }
 0x2ad   :  { %517 = vst [vmem:[%s1106_s8 + $0x8] sm:$0xff] %v382_v43  ;;  %498 = vmatmul.mubr.f32.gmra.mxu1 %v382_v43 }
 0x369   :  { %v493_v51 = vpop.f32.mrf.mxu1 }
 0x36a   :  { %v494_v53 = vadd.f32 %v493_v51, %v420_v49 }
 0x36b   :  { %v495_v54 = vpop.f32.mrf.mxu1 }
 0x36c   :  { %v508_v56 = vadd.f32 %v504_v52, %v494_v53  ;;  %518 = vst [vmem:[%s1109_s9] sm:$0xff] %v494_v53  ;;  %v496_v57 = vadd.f32 %v495_v54, %v424_v50 }
 0x36d   :  { %v499_v58 = vpop.f32.mrf.mxu1 }
 0x36e   :  { %512 = vst [vmem:[%s1110_s7] sm:$0xff] %v508_v56  ;;  %v509_v60 = vadd.f32 %v505_v55, %v496_v57  ;;  %519 = vst [vmem:[%s1109_s9 + $0x8] sm:$0xff] %v496_v57  ;;  %v500_v61 = vadd.f32 %v499_v58, %v420_v49 }
 0x36f   :  { %v501_v62 = vpop.f32.mrf.mxu1 }
 0x370   :  { %513 = vst [vmem:[%s1110_s7 + $0x8] sm:$0xff] %v509_v60  ;;  %v510_v0 = vadd.f32 %v506_v59, %v500_v61  ;;  %520 = vst [vmem:[%s1109_s9 + $0x10] sm:$0xff] %v500_v61  ;;  %v502_v1 = vadd.f32 %v501_v62, %v424_v50 }
 0x372   :  { %514 = vst [vmem:[%s1110_s7 + $0x10] sm:$0xff] %v510_v0  ;;  %v511_v2 = vadd.f32 %v507_v63, %v502_v1  ;;  %521 = vst [vmem:[%s1109_s9 + $0x18] sm:$0xff] %v502_v1 }
 0x374   :  { %515 = vst [vmem:[%s1110_s7 + $0x18] sm:$0xff] %v511_v2 }

</bundles_post_ra>
